<compile_context>
chip_gen: v6e
topology: v6e:2x2x1
jax: 0.10.0
libtpu: 0.0.40
codegen_flags: <defaults>
</compile_context>

<pallas_src>
import jax
import jax.numpy as jnp
from jax.experimental import pallas as pl
from jax.experimental.pallas import tpu as pltpu


def _round_up(n, m):
    return ((n + m - 1) // m) * m


def mlp_kernel(xT_ref, w1_ref, b1_ref, w2_ref, b2_ref, w3_ref, b3_ref, out_ref):
    # x tile: (IN, TB) float32, feature-major (lane-dense along batch).
    xT = xT_ref[...]

    # ---- Layer 1: Linear(IN -> 64) + ReLU ----  (64, IN) @ (IN, TB) -> (64, TB)
    h1 = jnp.dot(w1_ref[...], xT, preferred_element_type=jnp.float32)
    h1 = jnp.maximum(h1 + b1_ref[...], 0.0)          # bias (64,1) broadcasts over lanes

    # ---- Layer 2: Linear(64 -> 32) + ReLU ----  (32, 64) @ (64, TB) -> (32, TB)
    h2 = jnp.dot(w2_ref[...], h1, preferred_element_type=jnp.float32)
    h2 = jnp.maximum(h2 + b2_ref[...], 0.0)

    # ---- Layer 3: Linear(32 -> 1) ----  (1, 32) @ (32, TB) -> (1, TB)
    # Runs on the MXU (idle otherwise) to keep the VPU slot free at large TB.
    out = jnp.dot(w3_ref[...], h2, preferred_element_type=jnp.float32) + b3_ref[...]

    # Lane-dense (1, TB) store.
    out_ref[...] = out.astype(out_ref.dtype)


def som_model_forward(x, params, *, tile_batch=8192):
    """x: (B, IN) float32. Returns (B, 1) float32."""
    w1, b1 = params["w1"], params["b1"]   # (64, IN), (64, 1)
    w2, b2 = params["w2"], params["b2"]   # (32, 64), (32, 1)
    w3, b3 = params["w3"], params["b3"]   # (1, 32),  (1, 1)

    B, IN = x.shape
    H1 = w1.shape[0]
    H2 = w2.shape[0]

    # Batch tile: multiple of 128, capped by the padded batch so tiny batches
    # don't over-pad.
    b128 = _round_up(B, 128)
    tb = _round_up(min(int(tile_batch), b128), 128)
    # Keep at least 2 batch tiles whenever possible so the "parallel" batch
    # axis can be sharded across both TensorCores on v7x.
    if b128 // tb < 2 and b128 >= 256:
        tb = _round_up(-(-b128 // 2), 128)
    b_pad = _round_up(B, tb)
    grid = (b_pad // tb,)

    # Feature-major, lane-dense x: (IN, B_pad).
    # TODO(synk): in a real pipeline, fuse this transpose into the producer of
    # x (or emit x feature-major upstream) instead of paying a standalone pass.
    x_t = x.T
    if b_pad != B:
        x_t = jnp.pad(x_t, ((0, 0), (0, b_pad - B)))

    flops = 2 * b_pad * (IN * H1 + H1 * H2 + H2 * 1)
    bytes_accessed = 4 * (
        x_t.size + w1.size + b1.size + w2.size + b2.size + w3.size + b3.size + b_pad
    )

    out_row = pl.pallas_call(
        mlp_kernel,
        out_shape=jax.ShapeDtypeStruct((1, b_pad), jnp.float32),
        grid_spec=pltpu.PrefetchScalarGridSpec(
            num_scalar_prefetch=0,
            grid=grid,
            in_specs=[
                # x: (IN, tb) lane-dense blocks, pipelined HBM->VMEM per step.
                pl.BlockSpec((IN, tb), lambda i: (0, i)),
                # Weights / biases: full-array blocks with constant index maps
                # -> fetched once, VMEM-resident across the whole grid.
                pl.BlockSpec((H1, IN), lambda i: (0, 0)),
                pl.BlockSpec((H1, 1), lambda i: (0, 0)),
                pl.BlockSpec((H2, H1), lambda i: (0, 0)),
                pl.BlockSpec((H2, 1), lambda i: (0, 0)),
                pl.BlockSpec((1, H2), lambda i: (0, 0)),
                pl.BlockSpec((1, 1), lambda i: (0, 0)),
            ],
            # Lane-dense (1, tb) output blocks of a (1, b_pad) row.
            out_specs=pl.BlockSpec((1, tb), lambda i: (0, i)),
        ),
        compiler_params=pltpu.CompilerParams(
            # Batch tiles are independent; lets Mosaic shard them across both
            # TensorCores on v7x (no-op on single-TC v5e/v6e).
            dimension_semantics=("parallel",),
        ),
        cost_estimate=pl.CostEstimate(
            flops=flops, transcendentals=0, bytes_accessed=bytes_accessed
        ),
    )(x_t, w1, b1, w2, b2, w3, b3)

    # (1, b_pad) -> (b_pad, 1) -> drop padded rows.
    return out_row.reshape(b_pad, 1)[:B]


def init_params(key, input_size=10):
    """Deterministic init mimicking PyTorch nn.Linear defaults
    (uniform in [-1/sqrt(fan_in), 1/sqrt(fan_in)]), stored PyTorch-native
    (out_features, in_features) with biases as columns."""
    dims = [(input_size, 64), (64, 32), (32, 1)]
    params = {}
    keys = jax.random.split(key, 2 * len(dims))
    for i, (fan_in, fan_out) in enumerate(dims):
        bound = 1.0 / jnp.sqrt(jnp.float32(fan_in))
        w = jax.random.uniform(
            keys[2 * i], (fan_out, fan_in), jnp.float32, minval=-bound, maxval=bound
        )
        b = jax.random.uniform(
            keys[2 * i + 1], (fan_out, 1), jnp.float32, minval=-bound, maxval=bound
        )
        params[f"w{i + 1}"] = w
        params[f"b{i + 1}"] = b
    return params


def reference_forward(x, params):
    """Pure-JAX fp32 reference matching the PyTorch module."""
    h1 = jnp.maximum(x @ params["w1"].T + params["b1"].T, 0.0)      # (B, 64)
    h2 = jnp.maximum(h1 @ params["w2"].T + params["b2"].T, 0.0)     # (B, 32)
    return h2 @ params["w3"].T + params["b3"].T                     # (B, 1)


if __name__ == "__main__":
    key = jax.random.PRNGKey(0)
    k_params, k_x = jax.random.split(key)

    input_size = 10
    batch = 1000  # not a multiple of 128 -> exercises padding + multi-tile grid

    params = init_params(k_params, input_size=input_size)
    x = jax.random.normal(k_x, (batch, input_size), dtype=jnp.float32)

    out = som_model_forward(x, params)
    out = jax.block_until_ready(out)

    ref = reference_forward(x, params)
    assert out.shape == (batch, 1), out.shape
    assert jnp.allclose(out, ref, atol=1e-4, rtol=1e-4), "mismatch vs reference"

    print("KERNEL_OK")
</pallas_src>

<mosaic_0001>
module attributes {stable_mosaic.version = 11 : i64} {
  func.func @mlp_kernel(%arg0: i32, %arg1: memref<10x512xf32, #tpu.memory_space<vmem>>, %arg2: memref<64x10xf32, #tpu.memory_space<vmem>>, %arg3: memref<64x1xf32, #tpu.memory_space<vmem>>, %arg4: memref<32x64xf32, #tpu.memory_space<vmem>>, %arg5: memref<32x1xf32, #tpu.memory_space<vmem>>, %arg6: memref<1x32xf32, #tpu.memory_space<vmem>>, %arg7: memref<1x1xf32, #tpu.memory_space<vmem>>, %arg8: memref<1x512xf32, #tpu.memory_space<vmem>>) attributes {dimension_semantics = [#tpu.dimension_semantics<parallel>], iteration_bounds = array<i64: 2>, scalar_prefetch = 0 : i64, scratch_operands = 0 : i64, tpu.core_type = #tpu.core_type<tc>, window_params = [{transform_indices = @transform_0, window_bounds = array<i64: 10, 512>}, {pipeline_mode = #tpu.pipeline_mode<synchronous>, transform_indices = @transform_1, window_bounds = array<i64: 64, 10>}, {pipeline_mode = #tpu.pipeline_mode<synchronous>, transform_indices = @transform_2, window_bounds = array<i64: 64, 1>}, {pipeline_mode = #tpu.pipeline_mode<synchronous>, transform_indices = @transform_3, window_bounds = array<i64: 32, 64>}, {pipeline_mode = #tpu.pipeline_mode<synchronous>, transform_indices = @transform_4, window_bounds = array<i64: 32, 1>}, {pipeline_mode = #tpu.pipeline_mode<synchronous>, transform_indices = @transform_5, window_bounds = array<i64: 1, 32>}, {pipeline_mode = #tpu.pipeline_mode<synchronous>, transform_indices = @transform_6, window_bounds = array<i64: 1, 1>}, {transform_indices = @transform_7, window_bounds = array<i64: 1, 512>}]} {
    %c0 = arith.constant 0 : index
    %c0_0 = arith.constant 0 : index
    %0 = vector.load %arg1[%c0, %c0_0] : memref<10x512xf32, #tpu.memory_space<vmem>>, vector<10x512xf32>
    %c0_1 = arith.constant 0 : index
    %c0_2 = arith.constant 0 : index
    %1 = vector.load %arg2[%c0_1, %c0_2] : memref<64x10xf32, #tpu.memory_space<vmem>>, vector<64x10xf32>
    %cst = arith.constant dense<0.000000e+00> : vector<64x512xf32>
    %2 = tpu.matmul %1, %0, %cst {dimension_numbers = #tpu.dot_dimension_numbers<[1], [0], [0], [1], [0, 0, 1, 1], [], []>} : vector<64x10xf32>, vector<10x512xf32>, vector<64x512xf32> -> vector<64x512xf32>
    %c0_3 = arith.constant 0 : index
    %c0_4 = arith.constant 0 : index
    %3 = vector.load %arg3[%c0_3, %c0_4] : memref<64x1xf32, #tpu.memory_space<vmem>>, vector<64x1xf32>
    %4 = vector.broadcast %3 : vector<64x1xf32> to vector<64x512xf32>
    %5 = arith.addf %2, %4 : vector<64x512xf32>
    %cst_5 = arith.constant 0.000000e+00 : f32
    %6 = vector.broadcast %cst_5 : f32 to vector<64x512xf32>
    %7 = arith.maximumf %5, %6 : vector<64x512xf32>
    %c0_6 = arith.constant 0 : index
    %c0_7 = arith.constant 0 : index
    %8 = vector.load %arg4[%c0_6, %c0_7] : memref<32x64xf32, #tpu.memory_space<vmem>>, vector<32x64xf32>
    %cst_8 = arith.constant dense<0.000000e+00> : vector<32x512xf32>
    %9 = tpu.matmul %8, %7, %cst_8 {dimension_numbers = #tpu.dot_dimension_numbers<[1], [0], [0], [1], [0, 0, 1, 1], [], []>} : vector<32x64xf32>, vector<64x512xf32>, vector<32x512xf32> -> vector<32x512xf32>
    %c0_9 = arith.constant 0 : index
    %c0_10 = arith.constant 0 : index
    %10 = vector.load %arg5[%c0_9, %c0_10] : memref<32x1xf32, #tpu.memory_space<vmem>>, vector<32x1xf32>
    %11 = vector.broadcast %10 : vector<32x1xf32> to vector<32x512xf32>
    %12 = arith.addf %9, %11 : vector<32x512xf32>
    %cst_11 = arith.constant 0.000000e+00 : f32
    %13 = vector.broadcast %cst_11 : f32 to vector<32x512xf32>
    %14 = arith.maximumf %12, %13 : vector<32x512xf32>
    %c0_12 = arith.constant 0 : index
    %c0_13 = arith.constant 0 : index
    %15 = vector.load %arg6[%c0_12, %c0_13] : memref<1x32xf32, #tpu.memory_space<vmem>>, vector<1x32xf32>
    %cst_14 = arith.constant dense<0.000000e+00> : vector<1x512xf32>
    %16 = tpu.matmul %15, %14, %cst_14 {dimension_numbers = #tpu.dot_dimension_numbers<[1], [0], [0], [1], [0, 0, 1, 1], [], []>} : vector<1x32xf32>, vector<32x512xf32>, vector<1x512xf32> -> vector<1x512xf32>
    %c0_15 = arith.constant 0 : index
    %c0_16 = arith.constant 0 : index
    %17 = vector.load %arg7[%c0_15, %c0_16] : memref<1x1xf32, #tpu.memory_space<vmem>>, vector<1x1xf32>
    %18 = vector.broadcast %17 : vector<1x1xf32> to vector<1x512xf32>
    %19 = arith.addf %16, %18 : vector<1x512xf32>
    %c0_17 = arith.constant 0 : index
    %c0_18 = arith.constant 0 : index
    %20 = vector.load %arg8[%c0_17, %c0_18] : memref<1x512xf32, #tpu.memory_space<vmem>>, vector<1x512xf32>
    tpu.vector_store %arg8[%c0_17, %c0_18], %19 {strides = array<i32>} : memref<1x512xf32, #tpu.memory_space<vmem>>, vector<1x512xf32>,
    return
  }
  func.func @transform_0(%arg0: i32) -> (i32, i32) {
    %c0_i32 = arith.constant 0 : i32
    %c0_i32_0 = arith.constant 0 : i32
    return %c0_i32, %arg0 : i32, i32
  }
  func.func @transform_1(%arg0: i32) -> (i32, i32) {
    %c0_i32 = arith.constant 0 : i32
    %c0_i32_0 = arith.constant 0 : i32
    %c0_i32_1 = arith.constant 0 : i32
    return %c0_i32, %c0_i32_0 : i32, i32
  }
  func.func @transform_2(%arg0: i32) -> (i32, i32) {
    %c0_i32 = arith.constant 0 : i32
    %c0_i32_0 = arith.constant 0 : i32
    %c0_i32_1 = arith.constant 0 : i32
    return %c0_i32, %c0_i32_0 : i32, i32
  }
  func.func @transform_3(%arg0: i32) -> (i32, i32) {
    %c0_i32 = arith.constant 0 : i32
    %c0_i32_0 = arith.constant 0 : i32
    %c0_i32_1 = arith.constant 0 : i32
    return %c0_i32, %c0_i32_0 : i32, i32
  }
  func.func @transform_4(%arg0: i32) -> (i32, i32) {
    %c0_i32 = arith.constant 0 : i32
    %c0_i32_0 = arith.constant 0 : i32
    %c0_i32_1 = arith.constant 0 : i32
    return %c0_i32, %c0_i32_0 : i32, i32
  }
  func.func @transform_5(%arg0: i32) -> (i32, i32) {
    %c0_i32 = arith.constant 0 : i32
    %c0_i32_0 = arith.constant 0 : i32
    %c0_i32_1 = arith.constant 0 : i32
    return %c0_i32, %c0_i32_0 : i32, i32
  }
  func.func @transform_6(%arg0: i32) -> (i32, i32) {
    %c0_i32 = arith.constant 0 : i32
    %c0_i32_0 = arith.constant 0 : i32
    %c0_i32_1 = arith.constant 0 : i32
    return %c0_i32, %c0_i32_0 : i32, i32
  }
  func.func @transform_7(%arg0: i32) -> (i32, i32) {
    %c0_i32 = arith.constant 0 : i32
    %c0_i32_0 = arith.constant 0 : i32
    return %c0_i32, %arg0 : i32, i32
  }
}

</mosaic_0001>

<bundles_post_ra>
// kernel: tpu_custom_call.1
= control target key start
LH: loop header
LB: loop body
LE: loop exit
PB: predicated region body
PF: predicated region fallthrough
CT: control target
= control target key end

     0   :  { %s1642_s0 = inlined_call_operand.vmem [shape: f32[10,1024], index: 0, kind: input, shape index: {}]   ;;  %s1643_s1 = inlined_call_operand.vmem [shape: f32[64,10], index: 1, kind: input, shape index: {}]   ;;  %s1644_s2 = inlined_call_operand.vmem [shape: f32[64,1], index: 2, kind: input, shape index: {}]   ;;  %s1645_s3 = inlined_call_operand.vmem [shape: f32[32,64], index: 3, kind: input, shape index: {}]   ;;  %s1646_s4 = inlined_call_operand.vmem [shape: f32[32,1], index: 4, kind: input, shape index: {}]   ;;  %s1647_s5 = inlined_call_operand.vmem [shape: f32[1,32], index: 5, kind: input, shape index: {}]   ;;  %s1648_s6 = inlined_call_operand.<no memory space> [shape: f32[1,1], index: 6, kind: input, shape index: {}]   ;;  %s1649_s7 = inlined_call_operand.hbm [shape: f32[1,1024], index: 7, kind: output, shape index: {}]  }
   0x1   :  { %v12_v0 = vstv %s1648_s6 }
   0x2   :  { %13 = vst [vmem:[#allocation2] sm:$0x1] %v12_v0 }
   0x3   :  { %14 = vsyncpa [#allocation5], 0 }
   0x4   :  { %16 = vsyncpa [#allocation5 + $0x1], 0  ;;  %s1380_s26 = smov 0   ;;  %s1382_s27 = smov 0  }
   0x5   :  { %s1384_s28 = smov 0   ;;  %s1386_s29 = smov 0  }
   0x6 LB: > { %s1180_s6 = sadd.s32 4294967295, %s1331_s29   ;;  %s1181_s30 = sadd.s32 4294967294, %s1331_s29   ;;  %s1331_s29 = sphi %s1386_s29, %s1657_s29   ;;  %s1327_s28 = sphi %s1384_s28, %s1656_s28   ;;  %s1323_s27 = sphi %s1382_s27, %s1655_s27   ;;  %s1319_s26 = sphi %s1380_s26, %s1654_s26  }
   0x7   : > { %s1403_s8 = sadd.s32 1, %s1331_s29   ;;  %s29_s9 = sadd.s32 1, %s1327_s28 }
   0x8   : > { %s26_s10 = ssub.s32 %s1331_s29, %s1403_s8  ;;  %p36_p0 = scmp.ne.s32.totalorder %s1327_s28, %s1323_s27 }
   0x9   : > { %p27_p1 = scmp.eq.s32.totalorder %s26_s10, 0  ;;  %p37_p2 = scmp.eq.s32.totalorder %s1331_s29, 0 }
   0xa   : > { %p192_p3 = scmp.eq.s32.totalorder %s1180_s6, 1  ;;  %p197_p4 = scmp.ne.s32.totalorder %s1323_s27, %s1319_s26 }
   0xb   : > { %s1416_s11 = scalar_select %p27_p1, %s1327_s28, %s29_s9  }
   0xc   : > { %p38_p5 = por %p37_p2, %p36_p0  ;;  %p1418_p6 = por %p192_p3, %p36_p0 }
   0xd   : > { %p198_p7 = scmp.eq.s32.totalorder %s1181_s30, 1  ;;  %p1650_p9 = scmp.ge.s32.totalorder %s1331_s29, 2 }
   0xf   : > { %p1422_p8 = por %p198_p7, %p197_p4  ;;  %232 = sbr.rel (%p1650_p9) target bundleno = 28 (0x1c), region = 40 }
  0x14   : > { %235 = sbr.rel (!%p38_p5) target bundleno = 28 (0x1c), region = 44  ;;  %s237_s14 = sand.u32 (%p38_p5), 1, %s1327_s28  }
  0x15   : > { %s1225_s15 = sshll.u32 (%p38_p5), %s1331_s29, 5  ;;  %s1184_s16 = sshll.u32 (%p38_p5), %s237_s14, 6 }
  0x16   : > { %s242_s19 = scalar_lea.vmem (%p38_p5), %s1642_s0, %s1225_s15  ;;  %s239_s20 = scalar_lea.vmem (%p38_p5), [#allocation3], %s1184_s16 }
  0x17   : > { %v255_v1 = vld [vmem:[%s242_s19] sm:$0xff] (%p38_p5)  ;;  %v257_v2 = vld [vmem:[%s242_s19 + $0x8] sm:$0xff] (%p38_p5)  ;;  %v259_v3 = vld [vmem:[%s242_s19 + $0x10] sm:$0xff] (%p38_p5) }
  0x18   : > { %256 = vst [vmem:[%s239_s20] sm:$0xff] (%p38_p5), %v255_v1  ;;  %258 = vst [vmem:[%s239_s20 + $0x8] sm:$0xff] (%p38_p5), %v257_v2  ;;  %v261_v4 = vld [vmem:[%s242_s19 + $0x18] sm:$0xff] (%p38_p5)  ;;  %v263_v5 = vld [vmem:[%s242_s19 + $0x40] sm:$0xff] (%p38_p5) }
  0x19   : > { %260 = vst [vmem:[%s239_s20 + $0x10] sm:$0xff] %v259_v3  ;;  %v265_v6 = vld [vmem:[%s242_s19 + $0x48] sm:$0xff]  ;;  %262 = vst [vmem:[%s239_s20 + $0x18] sm:$0xff] %v261_v4  ;;  %v267_v7 = vld [vmem:[%s242_s19 + $0x50] sm:$0xff] }
  0x1a   : > { %264 = vst [vmem:[%s239_s20 + $0x20] sm:$0xff] %v263_v5  ;;  %266 = vst [vmem:[%s239_s20 + $0x28] sm:$0xff] %v265_v6  ;;  %v269_v8 = vld [vmem:[%s242_s19 + $0x58] sm:$0xff] }
  0x1b   : > { %268 = vst [vmem:[%s239_s20 + $0x30] sm:$0xff] %v267_v7  ;;  %270 = vst [vmem:[%s239_s20 + $0x38] sm:$0xff] %v269_v8 }
  0x1c PF: > { %p1187_p10 = scmp.ge.s32.totalorder %s1331_s29, 1  ;;  %p275_p11 = scmp.lt.s32.totalorder %s1331_s29, 3 }
  0x1e   : > { %p276_p12 = pnand %p1187_p10, %p275_p11 }
  0x1f   : > { %s1437_s21 = sand.u32 (!%p276_p12), 1, %s1323_s27   ;;  %s1226_s18 = sshll.u32 (!%p276_p12), %s1180_s6, 6 }
  0x20   : > { %279 = sbr.rel (%p276_p12) target bundleno = 724 (0x2d4), region = 67  ;;  %s1188_s22 = sshll.u32 (!%p276_p12), %s1437_s21, 6 }
  0x21   : > { %s284_s23 = scalar_lea.vmem (!%p276_p12), [#allocation3], %s1188_s22  ;;  %s1189_s17 = sshll.u32 (!%p276_p12), %s1437_s21, 2 }
  0x22   : > { %s312_s19 = scalar_lea.vmem (!%p276_p12), [#allocation4], %s1189_s17  ;;  %s1114_s24 = scalar_lea.hbm (!%p276_p12), %s1649_s7, %s1226_s18 }
  0x23   : > { %s1116_s20 = sshll.u32 (!%p276_p12), %s312_s19, 4  ;;  %s1102_s25 = scalar_lea.sflag (!%p276_p12), [#allocation5], %s1437_s21  ;;  %s1117_s20 = int_to_ptr.vmem [resolvable:$true] %s1116_s20 }
  0x24   : > { %s1271_s30 = scalar_lea.vmem (!%p276_p12), %s1117_s20, 64  ;;  %s1336_s9 = smov (!%p276_p12), [#allocation4]  }
  0x25   : > { %vm404_vm0 = vcmask 1041408   ;;  %v1333_v9 = vmov 0.0   ;;  %v1334_v10 = vmov 0   ;;  %v320_v11 = vld [vmem:[%s284_s23 + $0x28] sm:$0x3]  ;;  %v318_v16 = vld [vmem:[%s284_s23 + $0x18] sm:$0xff]  ;;  %p1272_p13 = scmp.ne.s32.totalorder %s1117_s20, %s1271_s30 }
  0x26   : > { %481 = vmatprep.mubr.f32.mxu0 %v1333_v9  ;;  %594 = vmatprep.mubr.f32.mxu1 %v1333_v9  ;;  %v322_v12 = vld [vmem:[%s284_s23 + $0x38] sm:$0x3]  ;;  %v319_v13 = vld [vmem:[%s284_s23 + $0x20] sm:$0x3]  ;;  %v321_v14 = vld [vmem:[%s284_s23 + $0x30] sm:$0x3] }
  0x27   : > { %1270 = vset.pattern.permute.xlu1 %v1334_v10  ;;  %1269 = vset.pattern.permute.xlu0 %v1334_v10  ;;  %v316_v15 = vld [vmem:[%s284_s23 + $0x8] sm:$0xff]  ;;  %v315_v17 = vld [vmem:[%s284_s23] sm:$0xff]  ;;  %v317_v18 = vld [vmem:[%s284_s23 + $0x10] sm:$0xff]  ;;  %vm379_vm1 = vcmask 80896   ;;  %vm703_vm2 = vcmask 523264   ;;  %vm921_vm3 = vcmask 261120   ;;  %p1273_p0 = pnand %p1272_p13, %p1418_p6 }
  0x28   : > { %1190 = vmatprep.subr.msk.mxu0 %vm404_vm0, %v320_v11  ;;  %1200 = vmatprep.subr.msk.mxu1 %vm404_vm0, %v322_v12  ;;  %v323_v19 = vld [vmem:[%s1643_s1] sm:$0xff]  ;;  %v336_v20 = vld [vmem:[%s1644_s2 + $0x28] sm:$0xff]  ;;  %v338_v21 = vld [vmem:[%s1644_s2 + $0x38] sm:$0xff]  ;;  %s1275_s10 = sshll.u32 %s1336_s9, 4  ;;  %s1276_s10 = int_to_ptr.vmem [resolvable:$false] %s1275_s10 }
  0x29   : > { %1191 = vmatpush1.msk.msra.mxu0 %vm404_vm0, %v319_v13  ;;  %1201 = vmatpush1.msk.msra.mxu1 %vm404_vm0, %v321_v14  ;;  %v324_v22 = vld [vmem:[%s1643_s1 + $0x8] sm:$0xff]  ;;  %v335_v23 = vld [vmem:[%s1644_s2 + $0x20] sm:$0xff]  ;;  %v337_v24 = vld [vmem:[%s1644_s2 + $0x30] sm:$0xff]  ;;  %p1274_p1 = pneg %p1273_p0  ;;  %s1277_s6 = scalar_lea.vmem %s1276_s10, 128 }
  0x2a   : > { %447 = vmatprep.subr.mxu0 %v316_v15  ;;  %560 = vmatprep.subr.mxu1 %v318_v16  ;;  %v325_v25 = vld [vmem:[%s1643_s1 + $0x10] sm:$0xff]  ;;  %v334_v27 = vld [vmem:[%s1644_s2 + $0x18] sm:$0xff]  ;;  %v331_v29 = vld [vmem:[%s1644_s2] sm:$0xff]  ;;  %p1278_p2 = scmp.lt.s32.totalorder %s1117_s20, %s1276_s10  ;;  %p1279_p3 = scmp.lt.s32.totalorder %s1277_s6, %s1271_s30 }
  0x2b   : > { %448 = vmatpush1.msra.mxu0 %v315_v17  ;;  %561 = vmatpush1.msra.mxu1 %v317_v18  ;;  %v333_v26 = vld [vmem:[%s1644_s2 + $0x10] sm:$0xff]  ;;  %v326_v28 = vld [vmem:[%s1643_s1 + $0x18] sm:$0xff]  ;;  %v332_v30 = vld [vmem:[%s1644_s2 + $0x8] sm:$0xff] }
  0x2c   : > { %1192 = vmatmul.mubr.msk.f32.vlgmr.msra.gmra.mxu0 %vm379_vm1, %v323_v19  ;;  %1202 = vmatmul.mubr.msk.f32.vlgmr.msra.gmra.mxu1 %vm379_vm1, %v323_v19  ;;  %v327_v31 = vld [vmem:[%s1643_s1 + $0x20] sm:$0xff]  ;;  %v682_v32 = vld [vmem:[%s1646_s4 + $0x18] sm:$0xff]  ;;  %v681_v33 = vld [vmem:[%s1646_s4 + $0x10] sm:$0xff]  ;;  %p1280_p4 = por %p1279_p3, %p1278_p2 }
  0x2d   : > { %487 = vmatprep.mubr.f32.mxu0 %v1333_v9  ;;  %600 = vmatprep.mubr.f32.mxu1 %v1333_v9  ;;  %v328_v34 = vld [vmem:[%s1643_s1 + $0x28] sm:$0xff]  ;;  %v679_v36 = vld [vmem:[%s1646_s4] sm:$0xff]  ;;  %v329_v37 = vld [vmem:[%s1643_s1 + $0x30] sm:$0xff] }
  0x2e   : > { %366 = vperm.xlu1 %1270, %v336_v20   ;;  %376 = vperm.xlu0 %1269, %v338_v21   ;;  %v680_v35 = vld [vmem:[%s1646_s4 + $0x8] sm:$0xff]  ;;  %v911_v38 = vld [vmem:[#allocation2] sm:$0x1]  ;;  %v330_v39 = vld [vmem:[%s1643_s1 + $0x38] sm:$0xff]  ;;  %p1281_p5 = pnand %p1280_p4, %p1274_p1 }
  0x30   : > { %1193 = vmatmul.mubr.msk.f32.gmra.mxu0 %vm379_vm1, %v324_v22  ;;  %1203 = vmatmul.mubr.msk.f32.gmra.mxu1 %vm379_vm1, %v324_v22 }
  0x31   : > { %493 = vmatprep.mubr.f32.mxu0 %v1333_v9  ;;  %606 = vmatprep.mubr.f32.mxu1 %v1333_v9 }
  0x32   : > { %361 = vperm.xlu1 %1270, %v335_v23   ;;  %371 = vperm.xlu0 %1269, %v337_v24  }
  0x34   : > { %1194 = vmatmul.mubr.msk.f32.gmra.mxu0 %vm379_vm1, %v325_v25  ;;  %1204 = vmatmul.mubr.msk.f32.gmra.mxu1 %vm379_vm1, %v325_v25 }
  0x35   : > { %499 = vmatprep.mubr.f32.mxu0 %v1333_v9  ;;  %612 = vmatprep.mubr.f32.mxu1 %v1333_v9 }
  0x36   : > { %351 = vperm.xlu1 %1270, %v333_v26   ;;  %356 = vperm.xlu0 %1269, %v334_v27  }
  0x38   : > { %1195 = vmatmul.mubr.msk.f32.gmra.mxu0 %vm379_vm1, %v326_v28  ;;  %1205 = vmatmul.mubr.msk.f32.gmra.mxu1 %vm379_vm1, %v326_v28 }
  0x39   : > { %505 = vmatprep.mubr.f32.mxu0 %v1333_v9  ;;  %618 = vmatprep.mubr.f32.mxu1 %v1333_v9 }
  0x3a   : > { %341 = vperm.xlu1 %1270, %v331_v29   ;;  %346 = vperm.xlu0 %1269, %v332_v30  }
  0x3c   : > { %1196 = vmatmul.mubr.msk.f32.gmra.mxu0 %vm379_vm1, %v327_v31  ;;  %1206 = vmatmul.mubr.msk.f32.gmra.mxu1 %vm379_vm1, %v327_v31 }
  0x3d   : > { %511 = vmatprep.mubr.f32.mxu0 %v1333_v9  ;;  %624 = vmatprep.mubr.f32.mxu1 %v1333_v9 }
  0x3e   : > { %700 = vperm.xlu0 %1269, %v682_v32   ;;  %695 = vperm.xlu1 %1270, %v681_v33  }
  0x40   : > { %1197 = vmatmul.mubr.msk.f32.gmra.mxu0 %vm379_vm1, %v328_v34  ;;  %1207 = vmatmul.mubr.msk.f32.gmra.mxu1 %vm379_vm1, %v328_v34 }
  0x41   : > { %517 = vmatprep.mubr.f32.mxu0 %v1333_v9  ;;  %630 = vmatprep.mubr.f32.mxu1 %v1333_v9 }
  0x42   : > { %690 = vperm.xlu0 %1269, %v680_v35   ;;  %685 = vperm.xlu1 %1270, %v679_v36  }
  0x44   : > { %1198 = vmatmul.mubr.msk.f32.gmra.mxu0 %vm379_vm1, %v329_v37  ;;  %1208 = vmatmul.mubr.msk.f32.gmra.mxu1 %vm379_vm1, %v329_v37 }
  0x45   : > { %523 = vmatprep.mubr.f32.mxu0 %v1333_v9  ;;  %636 = vmatprep.mubr.f32.mxu1 %v1333_v9 }
  0x46   : > { %914 = vperm.xlu0 %1269, %v911_v38  }
  0x48   : > { %1199 = vmatmul.mubr.msk.f32.gmra.mxu0 %vm379_vm1, %v330_v39  ;;  %1209 = vmatmul.mubr.msk.f32.gmra.mxu1 %vm379_vm1, %v330_v39 }
  0x49   : > { %780 = vmatprep.mubr.f32.mxu0 %v1333_v9  ;;  %869 = vmatprep.mubr.f32.mxu1 %v1333_v9 }
  0xa9   : > { %v377_v62 = vpop.permute.xlu0 %376  ;;  %v367_v1 = vpop.permute.xlu1 %366 }
  0xad   : > { %v372_v6 = vpop.permute.xlu0 %371  ;;  %v362_v10 = vpop.permute.xlu1 %361 }
  0xb1   : > { %v357_v21 = vpop.permute.xlu0 %356  ;;  %v352_v30 = vpop.permute.xlu1 %351 }
  0xec   : > { %v1538_v40 = vpop.f32.mrf.mxu0  ;;  %v1540_v41 = vpop.f32.mrf.mxu1 }
  0xee   : > { %v1542_v42 = vpop.f32.mrf.mxu0  ;;  %v1544_v43 = vpop.f32.mrf.mxu1 }
  0xf0   : > { %v1546_v44 = vpop.f32.mrf.mxu0  ;;  %v1548_v45 = vpop.f32.mrf.mxu1 }
  0xf2   : > { %v1550_v46 = vpop.f32.mrf.mxu0  ;;  %v1552_v47 = vpop.f32.mrf.mxu1 }
  0xf4   : > { %v1554_v48 = vpop.f32.mrf.mxu0  ;;  %v1556_v49 = vpop.f32.mrf.mxu1 }
  0xf6   : > { %v1558_v50 = vpop.f32.mrf.mxu0  ;;  %v1560_v51 = vpop.f32.mrf.mxu1 }
  0xf8   : > { %v501_v52 = vpop.f32.mrf.mxu0  ;;  %v614_v53 = vpop.f32.mrf.mxu1 }
  0xfa   : > { %v503_v54 = vpop.f32.mrf.mxu0  ;;  %v616_v55 = vpop.f32.mrf.mxu1 }
  0xfb   : > { %v504_v39 = vadd.f32 %v503_v54, %v357_v21  ;;  %v496_v54 = vadd.f32 %v1554_v48, %v352_v30 }
  0xfc   : > { %v507_v56 = vpop.f32.mrf.mxu0  ;;  %v620_v57 = vpop.f32.mrf.mxu1 }
  0xfd   : > { %v508_v35 = vadd.f32 %v507_v56, %v362_v10  ;;  %v621_v36 = vadd.f32 %v620_v57, %v362_v10  ;;  %v498_v56 = vadd.f32 %v1558_v50, %v352_v30  ;;  %v611_v57 = vadd.f32 %v1560_v51, %v352_v30 }
  0xfe   : > { %v509_v58 = vpop.f32.mrf.mxu0  ;;  %v622_v59 = vpop.f32.mrf.mxu1  ;;  %v656_v50 = vmax.f32 %v504_v39, 0.0 }
  0xff   : > { %v510_v31 = vadd.f32 %v509_v58, %v362_v10  ;;  %v623_v32 = vadd.f32 %v622_v59, %v362_v10 }
 0x100   : > { %v513_v60 = vpop.f32.mrf.mxu0  ;;  %v626_v61 = vpop.f32.mrf.mxu1 }
 0x101   : > { %v514_v26 = vadd.f32 %v513_v60, %v367_v1  ;;  %v627_v27 = vadd.f32 %v626_v61, %v367_v1  ;;  %v502_v61 = vadd.f32 %v501_v52, %v357_v21  ;;  %v661_v52 = vmax.f32 %v621_v36, 0.0 }
 0x102   : > { %v515_v63 = vpop.f32.mrf.mxu0  ;;  %v628_v0 = vpop.f32.mrf.mxu1 }
 0x103   : > { %v516_v22 = vadd.f32 %v515_v63, %v367_v1  ;;  %v629_v23 = vadd.f32 %v628_v0, %v367_v1  ;;  %v615_v0 = vadd.f32 %v614_v53, %v357_v21  ;;  %v663_v58 = vmax.f32 %v514_v26, 0.0  ;;  %v347_v1 = vpop.permute.xlu0 %346  ;;  %v342_v53 = vpop.permute.xlu1 %341 }
 0x104   : > { %v519_v2 = vpop.f32.mrf.mxu0  ;;  %v632_v3 = vpop.f32.mrf.mxu1  ;;  %v665_v59 = vmax.f32 %v627_v27, 0.0  ;;  %v490_v51 = vadd.f32 %v1546_v44, %v347_v1  ;;  %v655_v48 = vmax.f32 %v502_v61, 0.0 }
 0x105   : > { %v520_v19 = vadd.f32 %v519_v2, %v372_v6  ;;  %v633_v20 = vadd.f32 %v632_v3, %v372_v6  ;;  %v664_v63 = vmax.f32 %v516_v22, 0.0  ;;  %v666_v60 = vmax.f32 %v629_v23, 0.0 }
 0x106   : > { %v521_v4 = vpop.f32.mrf.mxu0  ;;  %v634_v5 = vpop.f32.mrf.mxu1  ;;  %v660_v2 = vmax.f32 %v510_v31, 0.0  ;;  %v662_v3 = vmax.f32 %v623_v32, 0.0  ;;  %v657_v10 = vmax.f32 %v615_v0, 0.0 }
 0x107   : > { %v522_v15 = vadd.f32 %v521_v4, %v372_v6  ;;  %v635_v16 = vadd.f32 %v634_v5, %v372_v6  ;;  %v667_v37 = vmax.f32 %v520_v19, 0.0  ;;  %v669_v38 = vmax.f32 %v633_v20, 0.0  ;;  %v676_v19 = vld [vmem:[%s1645_s3 + $0x8] sm:$0xff]  ;;  %v677_v20 = vld [vmem:[%s1645_s3 + $0x10] sm:$0xff]  ;;  %v701_v32 = vpop.permute.xlu0 %700 }
 0x108   : > { %v525_v7 = vpop.f32.mrf.mxu0  ;;  %v638_v8 = vpop.f32.mrf.mxu1  ;;  %v659_v4 = vmax.f32 %v508_v35, 0.0  ;;  %v492_v5 = vadd.f32 %v1550_v46, %v347_v1  ;;  %v605_v6 = vadd.f32 %v1552_v47, %v347_v1  ;;  %v654_v46 = vmax.f32 %v611_v57, 0.0 }
 0x109   : > { %v526_v11 = vadd.f32 %v525_v7, %v377_v62  ;;  %v639_v12 = vadd.f32 %v638_v8, %v377_v62  ;;  %v668_v33 = vmax.f32 %v522_v15, 0.0  ;;  %v670_v34 = vmax.f32 %v635_v16, 0.0  ;;  %v696_v35 = vpop.permute.xlu1 %695 }
 0x10a   : > { %v527_v13 = vpop.f32.mrf.mxu0  ;;  %v640_v14 = vpop.f32.mrf.mxu1  ;;  %v603_v8 = vadd.f32 %v1548_v45, %v347_v1  ;;  %v484_v47 = vadd.f32 %v1538_v40, %v342_v53  ;;  %v648_v45 = vmax.f32 %v492_v5, 0.0  ;;  %v650_v15 = vmax.f32 %v605_v6, 0.0 }
 0x10b   : > { %v528_v17 = vadd.f32 %v527_v13, %v377_v62  ;;  %v641_v18 = vadd.f32 %v640_v14, %v377_v62  ;;  %v671_v28 = vmax.f32 %v526_v11, 0.0  ;;  %v673_v29 = vmax.f32 %v639_v12, 0.0 }
 0x10c   : > { %v617_v62 = vadd.f32 %v616_v55, %v357_v21  ;;  %v609_v55 = vadd.f32 %v1556_v49, %v352_v30  ;;  %v486_v49 = vadd.f32 %v1542_v42, %v342_v53  ;;  %v599_v11 = vadd.f32 %v1544_v43, %v342_v53  ;;  %v678_v21 = vld [vmem:[%s1645_s3 + $0x18] sm:$0xff] }
 0x10d   : > { %v672_v24 = vmax.f32 %v528_v17, 0.0  ;;  %v674_v25 = vmax.f32 %v641_v18, 0.0  ;;  %v652_v12 = vmax.f32 %v498_v56, 0.0  ;;  %v597_v13 = vadd.f32 %v1540_v41, %v342_v53  ;;  %v675_v41 = vld [vmem:[%s1645_s3] sm:$0xff] }
 0x10e   : > { %v658_v7 = vmax.f32 %v617_v62, 0.0  ;;  %v651_v14 = vmax.f32 %v496_v54, 0.0  ;;  %v653_v44 = vmax.f32 %v609_v55, 0.0  ;;  %v647_v16 = vmax.f32 %v490_v51, 0.0  ;;  %v686_v54 = vpop.permute.xlu1 %685 }
 0x10f   : > { %732 = vmatprep.subr.mxu0 %v672_v24  ;;  %821 = vmatprep.subr.mxu1 %v674_v25  ;;  %v649_v42 = vmax.f32 %v603_v8, 0.0  ;;  %v644_v43 = vmax.f32 %v486_v49, 0.0  ;;  %v646_v17 = vmax.f32 %v599_v11, 0.0  ;;  %v643_v18 = vmax.f32 %v484_v47, 0.0 }
 0x110   : > { %733 = vmatpush1.msra.mxu0 %v671_v28  ;;  %822 = vmatpush1.msra.mxu1 %v673_v29  ;;  %v645_v40 = vmax.f32 %v597_v13, 0.0 }
 0x111   : > { %734 = vmatprep.subr.mxu0 %v668_v33  ;;  %823 = vmatprep.subr.mxu1 %v670_v34 }
 0x112   : > { %735 = vmatpush1.msra.mxu0 %v667_v37  ;;  %824 = vmatpush1.msra.mxu1 %v669_v38 }
 0x113   : > { %736 = vmatprep.subr.mxu0 %v664_v63  ;;  %825 = vmatprep.subr.mxu1 %v666_v60 }
 0x114   : > { %737 = vmatpush1.msra.mxu0 %v663_v58  ;;  %826 = vmatpush1.msra.mxu1 %v665_v59  ;;  %v691_v58 = vpop.permute.xlu0 %690 }
 0x115   : > { %738 = vmatprep.subr.mxu0 %v660_v2  ;;  %827 = vmatprep.subr.mxu1 %v662_v3 }
 0x116   : > { %739 = vmatpush1.msra.mxu0 %v659_v4  ;;  %828 = vmatpush1.msra.mxu1 %v661_v52 }
 0x117   : > { %740 = vmatprep.subr.mxu0 %v656_v50  ;;  %829 = vmatprep.subr.mxu1 %v658_v7 }
 0x118   : > { %741 = vmatpush1.msra.mxu0 %v655_v48  ;;  %830 = vmatpush1.msra.mxu1 %v657_v10 }
 0x119   : > { %742 = vmatprep.subr.mxu0 %v652_v12  ;;  %831 = vmatprep.subr.mxu1 %v654_v46 }
 0x11a   : > { %743 = vmatpush1.msra.mxu0 %v651_v14  ;;  %832 = vmatpush1.msra.mxu1 %v653_v44 }
 0x11b   : > { %744 = vmatprep.subr.mxu0 %v648_v45  ;;  %833 = vmatprep.subr.mxu1 %v650_v15  ;;  %v910_v45 = vld [vmem:[%s1647_s5] sm:$0x1]  ;;  %v917_v15 = vlaneseq }
 0x11c   : > { %745 = vmatpush1.msra.mxu0 %v647_v16  ;;  %834 = vmatpush1.msra.mxu1 %v649_v42  ;;  %v1335_v42 = vmov 1966171168  }
 0x11d   : > { %746 = vmatprep.subr.mxu0 %v644_v43  ;;  %835 = vmatprep.subr.mxu1 %v646_v17  ;;  %v918_v16 = vshrl.u32 %v917_v15, 7  ;;  %v1074_v43 = vunpack.c.l.s4 %v1335_v42  ;;  %vm1098_vm4 = vcmp.lt.s32.totalorder %v917_v15, 512 }
 0x11e   : > { %747 = vmatpush1.msra.mxu0 %v643_v18  ;;  %836 = vmatpush1.msra.mxu1 %v645_v40  ;;  %v915_v40 = vpop.permute.xlu0 %914 }
 0x11f   : > { %1210 = vmatmul.mubr.msk.f32.vlgmr.msra.gmra.mxu0 %vm703_vm2, %v675_v41  ;;  %1214 = vmatmul.mubr.msk.f32.vlgmr.msra.gmra.mxu1 %vm703_vm2, %v675_v41  ;;  %v919_v17 = vsub.s32 0, %v918_v16  ;;  %v1075_v18 = vunpack.c.0.s8 %v1074_v43 }
 0x120   : > { %786 = vmatprep.mubr.f32.mxu0 %v1333_v9  ;;  %875 = vmatprep.mubr.f32.mxu1 %v1333_v9 }
 0x123   : > { %1211 = vmatmul.mubr.msk.f32.gmra.mxu0 %vm703_vm2, %v676_v19  ;;  %1215 = vmatmul.mubr.msk.f32.gmra.mxu1 %vm703_vm2, %v676_v19 }
 0x124   : > { %792 = vmatprep.mubr.f32.mxu0 %v1333_v9  ;;  %881 = vmatprep.mubr.f32.mxu1 %v1333_v9 }
 0x127   : > { %1212 = vmatmul.mubr.msk.f32.gmra.mxu0 %vm703_vm2, %v677_v20  ;;  %1216 = vmatmul.mubr.msk.f32.gmra.mxu1 %vm703_vm2, %v677_v20  ;;  %v920_v20 = vrot.slane %v915_v40, %v919_v17 }
 0x128   : > { %798 = vmatprep.mubr.f32.mxu0 %v1333_v9  ;;  %887 = vmatprep.mubr.f32.mxu1 %v1333_v9 }
 0x12b   : > { %1213 = vmatmul.mubr.msk.f32.gmra.mxu0 %vm703_vm2, %v678_v21  ;;  %1217 = vmatmul.mubr.msk.f32.gmra.mxu1 %vm703_vm2, %v678_v21  ;;  %v1078_v21 = vsub.s32 %v1075_v18, %v918_v16 }
 0x12c   : > { %989 = vmatprep.mubr.f32.mxu0 %v1333_v9  ;;  %1060 = vmatprep.mubr.f32.mxu1 %v1333_v9 }
 0x1df   : > { %v782_v22 = vpop.f32.mrf.mxu0  ;;  %v871_v23 = vpop.f32.mrf.mxu1 }
 0x1e0   : > { %v783_v51 = vadd.f32 %v782_v22, %v686_v54  ;;  %v872_v8 = vadd.f32 %v871_v23, %v686_v54 }
 0x1e1   : > { %v784_v24 = vpop.f32.mrf.mxu0  ;;  %v873_v25 = vpop.f32.mrf.mxu1 }
 0x1e2   : > { %v785_v5 = vadd.f32 %v784_v24, %v686_v54  ;;  %v874_v6 = vadd.f32 %v873_v25, %v686_v54  ;;  %v894_v14 = vmax.f32 %v783_v51, 0.0  ;;  %v896_v44 = vmax.f32 %v872_v8, 0.0 }
 0x1e3   : > { %v788_v26 = vpop.f32.mrf.mxu0  ;;  %v877_v27 = vpop.f32.mrf.mxu1 }
 0x1e4   : > { %v789_v55 = vadd.f32 %v788_v26, %v691_v58  ;;  %v878_v4 = vadd.f32 %v877_v27, %v691_v58  ;;  %v895_v47 = vmax.f32 %v785_v5, 0.0  ;;  %v897_v13 = vmax.f32 %v874_v6, 0.0 }
 0x1e5   : > { %v790_v28 = vpop.f32.mrf.mxu0  ;;  %v879_v29 = vpop.f32.mrf.mxu1 }
 0x1e6   : > { %v791_v56 = vadd.f32 %v790_v28, %v691_v58  ;;  %v880_v57 = vadd.f32 %v879_v29, %v691_v58  ;;  %v898_v12 = vmax.f32 %v789_v55, 0.0  ;;  %v900_v46 = vmax.f32 %v878_v4, 0.0 }
 0x1e7   : > { %v794_v30 = vpop.f32.mrf.mxu0  ;;  %v883_v31 = vpop.f32.mrf.mxu1 }
 0x1e8   : > { %v795_v59 = vadd.f32 %v794_v30, %v696_v35  ;;  %v884_v1 = vadd.f32 %v883_v31, %v696_v35  ;;  %v899_v49 = vmax.f32 %v791_v56, 0.0  ;;  %v901_v11 = vmax.f32 %v880_v57, 0.0 }
 0x1e9   : > { %v796_v33 = vpop.f32.mrf.mxu0  ;;  %v885_v34 = vpop.f32.mrf.mxu1 }
 0x1ea   : > { %v797_v63 = vadd.f32 %v796_v33, %v696_v35  ;;  %v886_v60 = vadd.f32 %v885_v34, %v696_v35  ;;  %v902_v48 = vmax.f32 %v795_v59, 0.0  ;;  %v904_v10 = vmax.f32 %v884_v1, 0.0 }
 0x1eb   : > { %v800_v36 = vpop.f32.mrf.mxu0  ;;  %v889_v37 = vpop.f32.mrf.mxu1 }
 0x1ec   : > { %v801_v38 = vadd.f32 %v800_v36, %v701_v32  ;;  %v890_v39 = vadd.f32 %v889_v37, %v701_v32  ;;  %v903_v50 = vmax.f32 %v797_v63, 0.0  ;;  %v905_v7 = vmax.f32 %v886_v60, 0.0 }
 0x1ed   : > { %v802_v62 = vpop.f32.mrf.mxu0  ;;  %v891_v9 = vpop.f32.mrf.mxu1 }
 0x1ee   : > { %v803_v61 = vadd.f32 %v802_v62, %v701_v32  ;;  %v892_v0 = vadd.f32 %v891_v9, %v701_v32  ;;  %v906_v52 = vmax.f32 %v801_v38, 0.0  ;;  %v908_v53 = vmax.f32 %v890_v39, 0.0 }
 0x1f0   : > { %v907_v2 = vmax.f32 %v803_v61, 0.0  ;;  %v909_v3 = vmax.f32 %v892_v0, 0.0 }
 0x1f2   : > { %949 = vmatprep.subr.mxu0 %v907_v2  ;;  %1020 = vmatprep.subr.mxu1 %v909_v3 }
 0x1f3   : > { %950 = vmatpush1.msra.mxu0 %v906_v52  ;;  %1021 = vmatpush1.msra.mxu1 %v908_v53 }
 0x1f4   : > { %951 = vmatprep.subr.mxu0 %v903_v50  ;;  %1022 = vmatprep.subr.mxu1 %v905_v7 }
 0x1f5   : > { %952 = vmatpush1.msra.mxu0 %v902_v48  ;;  %1023 = vmatpush1.msra.mxu1 %v904_v10 }
 0x1f6   : > { %953 = vmatprep.subr.mxu0 %v899_v49  ;;  %1024 = vmatprep.subr.mxu1 %v901_v11 }
 0x1f7   : > { %954 = vmatpush1.msra.mxu0 %v898_v12  ;;  %1025 = vmatpush1.msra.mxu1 %v900_v46 }
 0x1f8   : > { %955 = vmatprep.subr.mxu0 %v895_v47  ;;  %1026 = vmatprep.subr.mxu1 %v897_v13 }
 0x1f9   : > { %956 = vmatpush1.msra.mxu0 %v894_v14  ;;  %1027 = vmatpush1.msra.mxu1 %v896_v44 }
 0x1fa   : > { %1218 = vmatmul.mubr.msk.f32.vlgmr.msra.gmra.mxu0 %vm921_vm3, %v910_v45  ;;  %1219 = vmatmul.mubr.msk.f32.vlgmr.msra.gmra.mxu1 %vm921_vm3, %v910_v45 }
 0x2ba   : > { %v991_v41 = vpop.f32.mrf.mxu0  ;;  %v1062_v19 = vpop.f32.mrf.mxu1 }
 0x2bb   : > { %v992_v24 = vadd.f32 %v991_v41, %v920_v20  ;;  %v1063_v25 = vadd.f32 %v1062_v19, %v920_v20 }
 0x2bc   : > { %v993_v22 = vpop.f32.mrf.mxu0  ;;  %v1064_v23 = vpop.f32.mrf.mxu1 }
 0x2bd   : > { %v994_v26 = vadd.f32 %v993_v22, %v920_v20  ;;  %v1065_v27 = vadd.f32 %v1064_v23, %v920_v20 }
 0x2bf   : > { %v1071_v28 = vcombine.low %v992_v24, %v994_v26  ;;  %v1072_v29 = vcombine.low %v1063_v25, %v1065_v27 }
 0x2c1   : > { %v1079_v30 = vrot.slane %v1071_v28, %v1078_v21  ;;  %v1086_v31 = vrot.slane %v1072_v29, %v1078_v21 }
 0x2c3   : > { %v1087_v32 = vcombine.low %v1079_v30, %v1086_v31 }
 0x2c5   : > { %v1094_v33 = vrot.slane %v1087_v32, %v1078_v21 }
 0x2c7   : > { %1100 = vst.msk [vmem:[%s312_s19] sm:$0xf] %vm1098_vm4, %v1094_v33 }
 0x2c8   : > { %1284 = shalt.err (!%p1281_p5)
}
 0x2c9   : > { %s1285_s14 = scalar_lea.hbm %s1114_s24, 64  ;;  %s1289_s16 = scalar_lea.hbm %s1649_s7, 128 }
 0x2ca   : > { %p1286_p7 = scmp.ne.s32.totalorder %s1114_s24, %s1285_s14  ;;  %p1290_p12 = scmp.lt.s32.totalorder %s1114_s24, %s1649_s7 }
 0x2cb   : > { %p1291_p13 = scmp.lt.s32.totalorder %s1289_s16, %s1285_s14 }
 0x2cc   : > { %p1287_p10 = pnand %p1286_p7, %p1418_p6 }
 0x2cd   : > { %p1292_p0 = por %p1291_p13, %p1290_p12 }
 0x2ce   : > { %p1288_p11 = pneg %p1287_p10 }
 0x2d0   : > { %p1293_p9 = pnand %p1292_p0, %p1288_p11 }
 0x2d2   : > { %1296 = shalt.err (!%p1293_p9)
}
 0x2d3   : > { %1227 = dma.vmem_to_hbm [thread:$0]  (%p1418_p6), %s1117_s20, 64, %s1114_s24, %s1102_s25  }
 0x2d4 PF: > { %s1128_s19 = sand.u32 1, %s1319_s26   ;;  %p1653_p1 = scmp.ge.s32.totalorder %s1331_s29, 2 }
 0x2d5   : > { %s1129_s22 = scalar_lea.sflag [#allocation5], %s1128_s19 }
 0x2d6   : > { %p1230_p2 = pnand %p1653_p1, %p1422_p8 }
 0x2d8   : > { %p1231_p3 = pneg %p1230_p2 }
 0x2da   : > { %1314 = dma.done.wait (%p1231_p3), %s1129_s22, 64  }
 0x2db   : > { %1316 = vsyncadd (%p1231_p3), %s1129_s22, 4294967232  ;;  %p19_p9 = scmp.ge.s32.totalorder %s1403_s8, 4   ;;  %s1654_s26 = smov %s1323_s27 }
 0x2dc   : > { %s1655_s27 = smov %s1327_s28  ;;  %s1656_s28 = smov %s1416_s11 }
 0x2dd   : > { %s1657_s29 = smov %s1403_s8  ;;  %21 = sbr.rel (!%p19_p9) target bundleno = 6 (0x6), region = 111 }
 0x2e2   :  { %1134 = vsyncpa [#allocation5], 1 }
 0x2e3   :  { %1136 = vsyncpa [#allocation5 + $0x1], 1 }

</bundles_post_ra>
